<compile_context>
chip_gen: v7x
topology: tpu7x:2x2x1
jax: 0.10.0
libtpu: 0.0.40
codegen_flags: <defaults>
</compile_context>

<pallas_src>
import jax
import jax.numpy as jnp
from jax.experimental import pallas as pl
from jax.experimental.pallas import tpu as pltpu


# ----------------------------------------------------------------------------- GELU
def _gelu_tanh(y):
    c = 0.7978845608028654  # sqrt(2/pi)
    return 0.5 * y * (1.0 + jnp.tanh(c * (y + 0.044715 * y * y * y)))


# ----------------------------------------------------------------------------- fused kernel
def _convt_bias_gelu_kernel(x_ref, w_ref, b_ref, o_ref):
    # x_ref/w_ref are already bf16 (cast upstream); MXU accumulates in f32.
    # K = Cin is tiny so the MXU is ~3% utilized -- fine, the kernel is HBM-bound.
    y = jnp.dot(x_ref[...], w_ref[...], preferred_element_type=jnp.float32)
    y = y + b_ref[...]                       # (1, N) bias broadcast over row tile
    o_ref[...] = _gelu_tanh(y).astype(o_ref.dtype)


def _round_up(a, b):
    return (a + b - 1) // b * b


def fused_matmul_bias_gelu(x2, w2, b2, *, max_block_m=2048, out_dtype=jnp.bfloat16):
    """(M,K) @ (K,N) + (1,N) bias, tanh-GELU.  bf16 in, f32 accum, out_dtype store."""
    M, K = x2.shape
    N = w2.shape[1]

    # Lane-dense output columns (unmasked vst): pad N to a multiple of 128.
    Np = _round_up(N, 128)
    if Np != N:
        w2 = jnp.pad(w2, ((0, 0), (0, Np - N)))
        b2 = jnp.pad(b2, ((0, 0), (0, Np - N)))

    # Row tile: as large as possible (amortize per-step overhead on single-TC
    # v5e/v6e), but keep the grid >= 2 blocks when M allows so both v7x
    # TensorCores get work along the "parallel" axis.
    bm = min(max_block_m, max(8, _round_up(pl.cdiv(M, 2), 8)))
    grid = (pl.cdiv(M, bm),)   # partial boundary block handled by Pallas masking

    out = pl.pallas_call(
        _convt_bias_gelu_kernel,
        out_shape=jax.ShapeDtypeStruct((M, Np), out_dtype),
        grid_spec=pltpu.PrefetchScalarGridSpec(
            num_scalar_prefetch=0,
            grid=grid,
            in_specs=[
                pl.BlockSpec((bm, K), lambda i: (i, 0)),    # activation row tile
                pl.BlockSpec((K, Np), lambda i: (0, 0)),    # full (tiny) weight
                pl.BlockSpec((1, Np), lambda i: (0, 0)),    # bias row (f32)
            ],
            out_specs=pl.BlockSpec((bm, Np), lambda i: (i, 0)),
        ),
        compiler_params=pltpu.CompilerParams(
            dimension_semantics=("parallel",),              # megacore sharding on v7x
        ),
    )(x2, w2, b2)

    if Np != N:
        out = out[:, :N]
    return out


# ----------------------------------------------------------------------------- UpSample forward
def upsample_forward(x, weight, bias, scale):
    """ConvTranspose2d(in_ch, out_ch, scale, stride=scale, padding=0) + GELU.

    x:      (B, Cin, H, W)        float32 (PyTorch NCHW)
    weight: (Cin, Cout, s, s)     float32 (PyTorch ConvTranspose2d layout)
    bias:   (Cout,)               float32
    returns (B, Cout, H*s, W*s)   float32
    """
    B, Cin, H, W = x.shape
    _, Cout, s, _ = weight.shape
    assert s == scale
    N = Cout * s * s

    # rows = input pixels, features = input channels; bf16 cast fused into the
    # relayout so the kernel DMAs half the activation bytes.
    x2 = x.transpose(0, 2, 3, 1).reshape(B * H * W, Cin).astype(jnp.bfloat16)
    w2 = weight.reshape(Cin, N).astype(jnp.bfloat16)        # n = co*s*s + i*s + j
    b2 = jnp.repeat(bias, s * s).reshape(1, N).astype(jnp.float32)

    y2 = fused_matmul_bias_gelu(x2, w2, b2)                 # (M, N) bf16

    # Pixel shuffle back to NCHW; f32 upcast fuses into this transpose so the
    # returned tensor matches the PyTorch float32 contract.
    # TODO(synk): for large real shapes, fold this relayout into the kernel by
    # writing (Cout, s, W*s) output slabs per (b, h) grid point so the pixel
    # shuffle happens on the VMEM-resident tile instead of an extra HBM pass.
    y = y2.reshape(B, H, W, Cout, s, s).astype(jnp.float32)
    y = y.transpose(0, 3, 1, 4, 2, 5)                       # B, Cout, H, s, W, s
    return y.reshape(B, Cout, H * s, W * s)


# ----------------------------------------------------------------------------- pure-JAX reference
def upsample_reference(x, weight, bias, scale):
    B, Cin, H, W = x.shape
    Cout = weight.shape[1]
    y = jnp.einsum("bchw,cdij->bdhiwj", x, weight)
    y = y + bias[None, :, None, None, None, None]
    y = y.reshape(B, Cout, H * scale, W * scale)
    return _gelu_tanh(y)


# ----------------------------------------------------------------------------- main
if __name__ == "__main__":
    # small shapes; Cout*scale^2 = 128 keeps the kernel output lane-dense as-is
    in_ch, out_ch, scale = 4, 32, 2
    B, H, W = 2, 16, 16

    key = jax.random.PRNGKey(0)
    kx, kw, kb = jax.random.split(key, 3)
    x = jax.random.normal(kx, (B, in_ch, H, W), jnp.float32)
    weight = jax.random.normal(kw, (in_ch, out_ch, scale, scale), jnp.float32) * 0.2
    bias = jax.random.normal(kb, (out_ch,), jnp.float32) * 0.1

    out = upsample_forward(x, weight, bias, scale)
    out = jax.block_until_ready(out)

    assert out.shape == (B, out_ch, H * scale, W * scale), out.shape
    assert out.dtype == jnp.float32
    assert bool(jnp.all(jnp.isfinite(out)))

    ref = upsample_reference(x, weight, bias, scale)
    assert jnp.allclose(out, ref, atol=3e-2, rtol=3e-2), float(jnp.max(jnp.abs(out - ref)))

    print("KERNEL_OK")
</pallas_src>

<mosaic_0001>
module attributes {stable_mosaic.version = 11 : i64} {
  func.func @_convt_bias_gelu_kernel(%arg0: i32, %arg1: memref<256x4xbf16, #tpu.memory_space<vmem>>, %arg2: memref<4x128xbf16, #tpu.memory_space<vmem>>, %arg3: memref<1x128xf32, #tpu.memory_space<vmem>>, %arg4: memref<256x128xbf16, #tpu.memory_space<vmem>>) attributes {dimension_semantics = [#tpu.dimension_semantics<parallel>], iteration_bounds = array<i64: 2>, scalar_prefetch = 0 : i64, scratch_operands = 0 : i64, tpu.core_type = #tpu.core_type<tc>, window_params = [{transform_indices = @transform_0, window_bounds = array<i64: 256, 4>}, {pipeline_mode = #tpu.pipeline_mode<synchronous>, transform_indices = @transform_1, window_bounds = array<i64: 4, 128>}, {pipeline_mode = #tpu.pipeline_mode<synchronous>, transform_indices = @transform_2, window_bounds = array<i64: 1, 128>}, {transform_indices = @transform_3, window_bounds = array<i64: 256, 128>}]} {
    %c0 = arith.constant 0 : index
    %c0_0 = arith.constant 0 : index
    %0 = vector.load %arg1[%c0, %c0_0] : memref<256x4xbf16, #tpu.memory_space<vmem>>, vector<256x4xbf16>
    %c0_1 = arith.constant 0 : index
    %c0_2 = arith.constant 0 : index
    %1 = vector.load %arg2[%c0_1, %c0_2] : memref<4x128xbf16, #tpu.memory_space<vmem>>, vector<4x128xbf16>
    %cst = arith.constant dense<0.000000e+00> : vector<256x128xf32>
    %2 = tpu.matmul %0, %1, %cst {dimension_numbers = #tpu.dot_dimension_numbers<[1], [0], [0], [1], [0, 0, 1, 1], [], []>} : vector<256x4xbf16>, vector<4x128xbf16>, vector<256x128xf32> -> vector<256x128xf32>
    %c0_3 = arith.constant 0 : index
    %c0_4 = arith.constant 0 : index
    %3 = vector.load %arg3[%c0_3, %c0_4] : memref<1x128xf32, #tpu.memory_space<vmem>>, vector<1x128xf32>
    %4 = vector.broadcast %3 : vector<1x128xf32> to vector<256x128xf32>
    %5 = arith.addf %2, %4 : vector<256x128xf32>
    %cst_5 = arith.constant 5.000000e-01 : f32
    %6 = vector.broadcast %cst_5 : f32 to vector<256x128xf32>
    %7 = arith.mulf %6, %5 : vector<256x128xf32>
    %cst_6 = arith.constant 4.471500e-02 : f32
    %8 = vector.broadcast %cst_6 : f32 to vector<256x128xf32>
    %9 = arith.mulf %8, %5 : vector<256x128xf32>
    %10 = arith.mulf %9, %5 : vector<256x128xf32>
    %11 = arith.mulf %10, %5 : vector<256x128xf32>
    %12 = arith.addf %5, %11 : vector<256x128xf32>
    %cst_7 = arith.constant 0.797884583 : f32
    %13 = vector.broadcast %cst_7 : f32 to vector<256x128xf32>
    %14 = arith.mulf %13, %12 : vector<256x128xf32>
    %15 = math.tanh %14 : vector<256x128xf32>
    %cst_8 = arith.constant 1.000000e+00 : f32
    %16 = vector.broadcast %cst_8 : f32 to vector<256x128xf32>
    %17 = arith.addf %16, %15 : vector<256x128xf32>
    %18 = arith.mulf %7, %17 : vector<256x128xf32>
    %19 = arith.truncf %18 : vector<256x128xf32> to vector<256x128xbf16>
    %c0_9 = arith.constant 0 : index
    %c0_10 = arith.constant 0 : index
    %20 = vector.load %arg4[%c0_9, %c0_10] : memref<256x128xbf16, #tpu.memory_space<vmem>>, vector<256x128xbf16>
    tpu.vector_store %arg4[%c0_9, %c0_10], %19 {strides = array<i32>} : memref<256x128xbf16, #tpu.memory_space<vmem>>, vector<256x128xbf16>,
    return
  }
  func.func @transform_0(%arg0: i32) -> (i32, i32) {
    %c0_i32 = arith.constant 0 : i32
    %c0_i32_0 = arith.constant 0 : i32
    return %arg0, %c0_i32 : i32, i32
  }
  func.func @transform_1(%arg0: i32) -> (i32, i32) {
    %c0_i32 = arith.constant 0 : i32
    %c0_i32_0 = arith.constant 0 : i32
    %c0_i32_1 = arith.constant 0 : i32
    return %c0_i32, %c0_i32_0 : i32, i32
  }
  func.func @transform_2(%arg0: i32) -> (i32, i32) {
    %c0_i32 = arith.constant 0 : i32
    %c0_i32_0 = arith.constant 0 : i32
    %c0_i32_1 = arith.constant 0 : i32
    return %c0_i32, %c0_i32_0 : i32, i32
  }
  func.func @transform_3(%arg0: i32) -> (i32, i32) {
    %c0_i32 = arith.constant 0 : i32
    %c0_i32_0 = arith.constant 0 : i32
    return %arg0, %c0_i32 : i32, i32
  }
}

</mosaic_0001>

<bundles_post_ra>
// kernel: tpu_custom_call.1
= control target key start
LH: loop header
LB: loop body
LE: loop exit
PB: predicated region body
PF: predicated region fallthrough
CT: control target
= control target key end

     0   :  { %8 = vsyncpa [#allocation3], 0  ;;  %s1988_s0 = inlined_call_operand.vmem [shape: bf16[512,4], index: 0, kind: input, shape index: {}]   ;;  %s1989_s1 = inlined_call_operand.vmem [shape: bf16[4,128], index: 1, kind: input, shape index: {}]   ;;  %s1990_s2 = inlined_call_operand.vmem [shape: f32[1,128], index: 2, kind: input, shape index: {}]   ;;  %s1991_s3 = inlined_call_operand.hbm [shape: bf16[512,128], index: 3, kind: output, shape index: {}]  }
   0x1   :  { %10 = vsyncpa [#allocation3 + $0x1], 0  ;;  %s1499_s12 = smov 0   ;;  %s1501_s13 = smov 0  }
   0x2   :  { %s1503_s14 = smov 0   ;;  %s1505_s15 = smov 0  }
   0x3 LB: > { %s1520_s16 = sadd.s32 4294967295, %s1474_s15   ;;  %s1031_s17 = sadd.s32 4294967294, %s1474_s15   ;;  %s1474_s15 = sphi %s1505_s15, %s1997_s15   ;;  %s1470_s14 = sphi %s1503_s14, %s1996_s14   ;;  %s1466_s13 = sphi %s1501_s13, %s1995_s13   ;;  %s1462_s12 = sphi %s1499_s12, %s1994_s12  }
   0x4   : > { %s1524_s18 = sadd.s32 1, %s1474_s15   ;;  %s91_s19 = sadd.s32 1, %s1470_s14 }
   0x5   : > { %s88_s20 = ssub.s32 %s1474_s15, %s1524_s18  ;;  %p101_p0 = scmp.ne.s32.totalorder %s1470_s14, %s1466_s13 }
   0x6   : > { %p89_p1 = scmp.eq.s32.totalorder %s88_s20, 0  ;;  %p102_p2 = scmp.eq.s32.totalorder %s1520_s16, 1 }
   0x7   : > { %p107_p3 = scmp.ne.s32.totalorder %s1466_s13, %s1462_s12  ;;  %p108_p4 = scmp.eq.s32.totalorder %s1031_s17, 1 }
   0x8   : > { %s1535_s21 = scalar_select %p89_p1, %s1470_s14, %s91_s19  }
   0x9   : > { %p1537_p5 = por %p102_p2, %p101_p0  ;;  %p1541_p6 = por %p108_p4, %p107_p3 }
   0xa   : > { %p1034_p7 = scmp.ge.s32.totalorder %s1474_s15, 1  ;;  %p141_p8 = scmp.lt.s32.totalorder %s1474_s15, 3 }
   0xc   : > { %p142_p9 = pnand %p1034_p7, %p141_p8 }
   0xd   : > { %v205_v0 = vld [vmem:[%s1989_s1] sm:$0x3] (!%p142_p9)  ;;  %vm342_vm0 = vcmask (!%p142_p9), 1041408   ;;  %s1036_s26 = sshll.u32 (!%p142_p9), %s1520_s16, 5  ;;  %vm293_vm1 = vcmask (!%p142_p9), 31744   ;;  %s162_s6 = sand.u32 (!%p142_p9), 1, %s1466_s13  }
   0xe   : > { %145 = sbr.rel (%p142_p9) target bundleno = 353 (0x161), region = 32  ;;  %1289 = vmatprep.subr.msk.bf16.mxu0 (!%p142_p9), %vm342_vm0, %v205_v0  ;;  %1290 = vmatprep.subr.msk.bf16.mxu1 (!%p142_p9), %vm342_vm0, %v205_v0  ;;  %v344_v1 = vsel (!%p142_p9), %vm342_vm0, %v205_v0, 0  ;;  %p166_p10 = scmp.lt.s32.totalorder (!%p142_p9), %s1036_s26, 63  ;;  %v1591_v18 = vld [vmem:[%s1990_s2] ss:$0 sm:$0xff] (!%p142_p9) }
   0xf   : > { %1254 = vmatpush3.bf16.msra.mxu0 (!%p142_p9), %v344_v1  ;;  %1288 = vmatpush3.bf16.msra.mxu1 (!%p142_p9), %v344_v1  ;;  %s1035_s7 = sshll.u32 (!%p142_p9), %s162_s6, 7  ;;  %s1140_s9 = sshll.u32 (!%p142_p9), %s1520_s16, 11 }
  0x10   : > { %s1751_s8 = scalar_lea.vmem (!%p142_p9), [#allocation2], %s1035_s7  ;;  %s1940_s19 = scalar_lea.hbm (!%p142_p9), %s1991_s3, %s1140_s9 }
  0x11   : > { %s969_s10 = sshll.u32 (!%p142_p9), %s1751_s8, 4  ;;  %s1947_s20 = scalar_lea.sflag (!%p142_p9), [#allocation3], %s162_s6  ;;  %s1942_s10 = int_to_ptr.vmem [resolvable:$true] %s969_s10 }
  0x12   : > { %s1412_s16 = scalar_lea.vmem (!%p142_p9), %s1942_s10, 2048  ;;  %s1476_s24 = smov (!%p142_p9), [#allocation2]  }
  0x13   : > { %p1413_p11 = scmp.ne.s32.totalorder (!%p142_p9), %s1942_s10, %s1412_s16  ;;  %s1416_s25 = sshll.u32 (!%p142_p9), %s1476_s24, 4  ;;  %s1417_s25 = int_to_ptr.vmem [resolvable:$false] %s1416_s25 }
  0x14   : > { %p1419_p0 = scmp.lt.s32.totalorder (!%p142_p9), %s1942_s10, %s1417_s25 }
  0x15   : > { %s1999_s26 = smov (!%p166_p10, %s1036_s26), 63  ;;  %p1414_p12 = pnand %p1413_p11, %p1537_p5 }
  0x16   : > { %s1037_s27 = sshll.u32 %s1999_s26, 2  ;;  %s1418_s26 = scalar_lea.vmem %s1417_s25, 4096 }
  0x17   : > { %s1554_s30 = scalar_lea.vmem %s1988_s0, %s1037_s27  ;;  %p1415_p13 = pneg %p1414_p12 }
  0x18   : > { %v1332_v2 = vld [vmem:[%s1554_s30] sm:$0xff]   ;;  %v1334_v4 = vld [vmem:[%s1554_s30 + $0x8] sm:$0xff]   ;;  %v1336_v6 = vld [vmem:[%s1554_s30 + $0x10] sm:$0xff]   ;;  %p1420_p1 = scmp.lt.s32.totalorder %s1418_s26, %s1412_s16 }
  0x19   : > { %v1333_v3 = vld [vmem:[%s1554_s30 + $0x40] sm:$0xff]   ;;  %1255 = vmatprep.mubr.msk.bf16.mxu0 %vm293_vm1, %v1332_v2  ;;  %v1335_v5 = vld [vmem:[%s1554_s30 + $0x48] sm:$0xff]   ;;  %v1337_v7 = vld [vmem:[%s1554_s30 + $0x50] sm:$0xff]  }
  0x1a   : > { %1271 = vmatprep.mubr.msk.bf16.mxu1 %vm293_vm1, %v1333_v3  ;;  %1256 = vmatmul.mubr.msk.bf16.vlgmr.msra.gmra.mrb[0].mxu0 %vm293_vm1, %v1334_v4  ;;  %v1338_v8 = vld [vmem:[%s1554_s30 + $0x18] sm:$0xff]   ;;  %v1340_v10 = vld [vmem:[%s1554_s30 + $0x20] sm:$0xff]   ;;  %v1342_v12 = vld [vmem:[%s1554_s30 + $0x28] sm:$0xff]   ;;  %p1421_p2 = por %p1420_p1, %p1419_p0 }
  0x1b   : > { %1272 = vmatmul.mubr.msk.bf16.vlgmr.msra.gmra.mrb[0].mxu1 %vm293_vm1, %v1335_v5  ;;  %1259 = vmatprep.mubr.msk.bf16.mxu0 %vm293_vm1, %v1336_v6  ;;  %v1339_v9 = vld [vmem:[%s1554_s30 + $0x58] sm:$0xff]   ;;  %v1341_v11 = vld [vmem:[%s1554_s30 + $0x60] sm:$0xff]   ;;  %v1343_v13 = vld [vmem:[%s1554_s30 + $0x68] sm:$0xff]  }
  0x1c   : > { %1275 = vmatprep.mubr.msk.bf16.mxu1 %vm293_vm1, %v1337_v7  ;;  %v1344_v14 = vld [vmem:[%s1554_s30 + $0x30] sm:$0xff]   ;;  %v1346_v16 = vld [vmem:[%s1554_s30 + $0x38] sm:$0xff]   ;;  %p1422_p3 = pnand %p1421_p2, %p1415_p13 }
  0x1d   : > { %v1345_v15 = vld [vmem:[%s1554_s30 + $0x70] sm:$0xff]   ;;  %v1347_v17 = vld [vmem:[%s1554_s30 + $0x78] sm:$0xff]  }
  0x22   : > { %1260 = vmatmul.mubr.msk.bf16.gmra.mrb[4].mxu0 %vm293_vm1, %v1338_v8 }
  0x23   : > { %1276 = vmatmul.mubr.msk.bf16.gmra.mrb[4].mxu1 %vm293_vm1, %v1339_v9  ;;  %1263 = vmatprep.mubr.msk.bf16.mxu0 %vm293_vm1, %v1340_v10 }
  0x24   : > { %1279 = vmatprep.mubr.msk.bf16.mxu1 %vm293_vm1, %v1341_v11 }
  0x2a   : > { %1264 = vmatmul.mubr.msk.bf16.gmra.mrb[8].mxu0 %vm293_vm1, %v1342_v12 }
  0x2b   : > { %1280 = vmatmul.mubr.msk.bf16.gmra.mrb[8].mxu1 %vm293_vm1, %v1343_v13  ;;  %1267 = vmatprep.mubr.msk.bf16.mxu0 %vm293_vm1, %v1344_v14 }
  0x2c   : > { %1283 = vmatprep.mubr.msk.bf16.mxu1 %vm293_vm1, %v1345_v15 }
  0x32   : > { %1268 = vmatmul.mubr.msk.bf16.gmra.mrb[12].mxu0 %vm293_vm1, %v1346_v16 }
  0x33   : > { %1284 = vmatmul.mubr.msk.bf16.gmra.mrb[12].mxu1 %vm293_vm1, %v1347_v17 }
  0xed   : > { %v1257_v19 = vpop.f32.mrb[0].mxu0 }
  0xee   : > { %v1594_v20 = vadd.f32 %v1257_v19, %v1591_v18  ;;  %v1273_v21 = vpop.f32.mrb[0].mxu1  ;;  %v380_v22 = vpop.f32.mrb[1].mxu0 }
  0xef   : > { %v1597_v23 = vadd.f32 %v1273_v21, %v1591_v18  ;;  %v1600_v24 = vadd.f32 %v1591_v18, %v380_v22  ;;  %v444_v25 = vpop.f32.mrb[1].mxu1  ;;  %v1258_v26 = vpop.f32.mrb[2].mxu0 }
  0xf0   : > { %v541_v27 = vmul.f32 0.044715, %v1594_v20  ;;  %v1604_v28 = vadd.f32 %v1591_v18, %v444_v25  ;;  %v1607_v29 = vadd.f32 %v1258_v26, %v1591_v18  ;;  %v1274_v30 = vpop.f32.mrb[2].mxu1  ;;  %v383_v31 = vpop.f32.mrb[3].mxu0  ;;  %v509_v19 = vmul.f32 0.5, %v1594_v20 }
  0xf1   : > { %v557_v32 = vmul.f32 0.044715, %v1597_v23  ;;  %v539_v33 = vmul.f32 0.044715, %v1600_v24  ;;  %v447_v36 = vpop.f32.mrb[3].mxu1  ;;  %v1617_v40 = vadd.f32 %v1274_v30, %v1591_v18  ;;  %v1622_v43 = vadd.f32 %v1591_v18, %v383_v31 }
  0xf2   : > { %v573_v34 = vmul.f32 %v541_v27, %v1594_v20  ;;  %v555_v35 = vmul.f32 0.044715, %v1604_v28  ;;  %v542_v39 = vmul.f32 0.044715, %v1607_v29  ;;  %v1631_v51 = vadd.f32 %v1591_v18, %v447_v36 }
  0xf3   : > { %v589_v37 = vmul.f32 %v557_v32, %v1597_v23  ;;  %v571_v38 = vmul.f32 %v539_v33, %v1600_v24  ;;  %v558_v50 = vmul.f32 0.044715, %v1617_v40  ;;  %v540_v57 = vmul.f32 0.044715, %v1622_v43 }
  0xf4   : > { %v605_v41 = vmul.f32 %v573_v34, %v1594_v20  ;;  %v587_v42 = vmul.f32 %v555_v35, %v1604_v28  ;;  %v574_v46 = vmul.f32 %v542_v39, %v1607_v29  ;;  %v556_v8 = vmul.f32 0.044715, %v1631_v51 }
  0xf5   : > { %v621_v44 = vmul.f32 %v589_v37, %v1597_v23  ;;  %v603_v45 = vmul.f32 %v571_v38, %v1600_v24  ;;  %v1261_v47 = vpop.f32.mrb[4].mxu0  ;;  %v590_v62 = vmul.f32 %v558_v50, %v1617_v40  ;;  %v572_v4 = vmul.f32 %v540_v57, %v1622_v43 }
  0xf6   : > { %v637_v48 = vadd.f32 %v605_v41, %v1594_v20  ;;  %v619_v49 = vmul.f32 %v587_v42, %v1604_v28  ;;  %v1277_v52 = vpop.f32.mrb[4].mxu1  ;;  %v396_v53 = vpop.f32.mrb[5].mxu0  ;;  %v606_v56 = vmul.f32 %v574_v46, %v1607_v29  ;;  %v1651_v11 = vadd.f32 %v1261_v47, %v1591_v18 }
  0xf7   : > { %v653_v54 = vadd.f32 %v621_v44, %v1597_v23  ;;  %v635_v55 = vadd.f32 %v603_v45, %v1600_v24  ;;  %v460_v58 = vpop.f32.mrb[5].mxu1  ;;  %v1262_v59 = vpop.f32.mrb[6].mxu0  ;;  %v622_v7 = vmul.f32 %v590_v62, %v1617_v40  ;;  %v604_v10 = vmul.f32 %v572_v4, %v1622_v43 }
  0xf8   : > { %v669_v60 = vmul.f32 0.7978846, %v637_v48  ;;  %v651_v61 = vadd.f32 %v619_v49, %v1604_v28  ;;  %v1639_v63 = vpop.f32.mrb[6].mxu1  ;;  %v1641_v0 = vpop.f32.mrb[7].mxu0  ;;  %v638_v3 = vadd.f32 %v606_v56, %v1607_v29  ;;  %v588_v13 = vmul.f32 %v556_v8, %v1631_v51 }
  0xf9   : > { %v685_v1 = vmul.f32 0.7978846, %v653_v54  ;;  %v667_v2 = vmul.f32 0.7978846, %v635_v55  ;;  %v1645_v5 = vpop.f32.mrb[7].mxu1  ;;  %v654_v12 = vadd.f32 %v622_v7, %v1617_v40  ;;  %v1656_v14 = vadd.f32 %v1277_v52, %v1591_v18 }
  0xfa   : > { %1348 = vtanh.f32 %v669_v60  ;;  %v683_v6 = vmul.f32 0.7978846, %v651_v61  ;;  %v670_v9 = vmul.f32 0.7978846, %v638_v3  ;;  %v636_v15 = vadd.f32 %v604_v10, %v1622_v43 }
  0xfb   : > { %1350 = vtanh.f32 %v685_v1  ;;  %v545_v16 = vmul.f32 0.044715, %v1651_v11  ;;  %v686_v21 = vmul.f32 0.7978846, %v654_v12  ;;  %v620_v22 = vmul.f32 %v588_v13, %v1631_v51 }
  0xfc   : > { %1352 = vtanh.f32 %v667_v2  ;;  %v668_v27 = vmul.f32 0.7978846, %v636_v15  ;;  %v561_v31 = vmul.f32 0.044715, %v1656_v14  ;;  %v1671_v32 = vadd.f32 %v1591_v18, %v396_v53 }
  0xfd   : > { %1354 = vtanh.f32 %v683_v6  ;;  %v1660_v17 = vpop.f32.mrb[8].mxu0  ;;  %v577_v30 = vmul.f32 %v545_v16, %v1651_v11  ;;  %v652_v20 = vadd.f32 %v620_v22, %v1631_v51  ;;  %v1679_v35 = vadd.f32 %v1591_v18, %v460_v58 }
  0xfe   : > { %1356 = vtanh.f32 %v670_v9  ;;  %v1664_v25 = vpop.f32.mrb[8].mxu1  ;;  %v1666_v26 = vpop.f32.mrb[9].mxu0  ;;  %v1682_v36 = vadd.f32 %v1262_v59, %v1591_v18  ;;  %v525_v39 = vmul.f32 0.5, %v1597_v23  ;;  %v593_v42 = vmul.f32 %v561_v31, %v1656_v14 }
  0xff   : > { %v1673_v33 = vpop.f32.mrb[9].mxu1  ;;  %v1675_v34 = vpop.f32.mrb[10].mxu0  ;;  %1358 = vtanh.f32 %v686_v21  ;;  %v609_v41 = vmul.f32 %v577_v30, %v1651_v11  ;;  %v507_v45 = vmul.f32 0.5, %v1600_v24  ;;  %v1695_v46 = vmul.f32 0.5, %v1604_v28 }
 0x100   : > { %v1684_v37 = vpop.f32.mrb[10].mxu1  ;;  %v1686_v38 = vpop.f32.mrb[11].mxu0  ;;  %1360 = vtanh.f32 %v668_v27  ;;  %v684_v47 = vmul.f32 0.7978846, %v652_v20  ;;  %v543_v48 = vmul.f32 0.044715, %v1671_v32  ;;  %v625_v50 = vmul.f32 %v593_v42, %v1656_v14 }
 0x101   : > { %v1691_v44 = vpop.f32.mrb[11].mxu1  ;;  %v641_v49 = vadd.f32 %v609_v41, %v1651_v11  ;;  %v559_v23 = vmul.f32 0.044715, %v1679_v35  ;;  %v546_v52 = vmul.f32 0.044715, %v1682_v36  ;;  %v510_v54 = vmul.f32 0.5, %v1607_v29 }
 0x102   : > { %v526_v24 = vmul.f32 0.5, %v1617_v40  ;;  %1362 = vtanh.f32 %v684_v47  ;;  %v575_v28 = vmul.f32 %v543_v48, %v1671_v32  ;;  %v657_v58 = vadd.f32 %v625_v50, %v1656_v14 }
 0x103   : > { %v673_v57 = vmul.f32 0.7978846, %v641_v49  ;;  %v591_v59 = vmul.f32 %v559_v23, %v1679_v35  ;;  %v578_v29 = vmul.f32 %v546_v52, %v1682_v36  ;;  %v1714_v40 = vadd.f32 %v1639_v63, %v1591_v18 }
 0x104   : > { %v1349_v53 = vpop.eup %1348  ;;  %v607_v1 = vmul.f32 %v575_v28, %v1671_v32  ;;  %v508_v6 = vmul.f32 0.5, %v1622_v43  ;;  %v524_v7 = vmul.f32 0.5, %v1631_v51  ;;  %v689_v8 = vmul.f32 0.7978846, %v657_v58 }
 0x105   : > { %v1351_v55 = vpop.eup %1350  ;;  %v733_v56 = vadd.f32 1.0, %v1349_v53  ;;  %v1707_v60 = vpop.f32.mrb[12].mxu0  ;;  %v1724_v9 = vadd.f32 %v1591_v18, %v1641_v0  ;;  %v623_v21 = vmul.f32 %v591_v59, %v1679_v35  ;;  %1364 = vtanh.f32 %v673_v57 }
 0x106   : > { %v1353_v61 = vpop.eup %1352  ;;  %v749_v62 = vadd.f32 1.0, %v1351_v55  ;;  %v1716_v2 = vpop.f32.mrb[12].mxu1  ;;  %v639_v16 = vadd.f32 %v607_v1, %v1671_v32  ;;  %v610_v27 = vmul.f32 %v578_v29, %v1682_v36  ;;  %v562_v42 = vmul.f32 0.044715, %v1714_v40 }
 0x107   : > { %v1718_v3 = vpop.f32.mrb[13].mxu0  ;;  %v1355_v4 = vpop.eup %1354  ;;  %v765_v13 = vmul.f32 %v733_v56, %v509_v19  ;;  %v731_v15 = vadd.f32 1.0, %v1353_v61  ;;  %v655_v41 = vadd.f32 %v623_v21, %v1679_v35  ;;  %1366 = vtanh.f32 %v689_v8 }
 0x108   : > { %v1726_v10 = vpop.f32.mrb[13].mxu1  ;;  %v1728_v12 = vpop.f32.mrb[14].mxu0  ;;  %v781_v51 = vmul.f32 %v749_v62, %v525_v39  ;;  %v747_v19 = vadd.f32 1.0, %v1355_v4  ;;  %v671_v20 = vmul.f32 0.7978846, %v639_v16  ;;  %v642_v39 = vadd.f32 %v610_v27, %v1682_v36 }
 0x109   : > { %v1357_v63 = vpop.eup %1356  ;;  %v1732_v22 = vpop.f32.mrb[14].mxu1  ;;  %v763_v50 = vmul.f32 %v731_v15, %v507_v45  ;;  %v594_v52 = vmul.f32 %v562_v42, %v1714_v40  ;;  %v544_v56 = vmul.f32 0.044715, %v1724_v9  ;;  %v687_v59 = vmul.f32 0.7978846, %v655_v41 }
 0x10a   : > { %v1734_v43 = vpop.f32.mrb[15].mxu0  ;;  %v734_v0 = vadd.f32 1.0, %v1357_v63  ;;  %v1739_v30 = vpop.f32.mrb[15].mxu1  ;;  %1368 = vtanh.f32 %v671_v20  ;;  %v674_v55 = vmul.f32 0.7978846, %v642_v39  ;;  %v779_v1 = vmul.f32 %v747_v19, %v1695_v46 }
 0x10b   : > { %v1359_v31 = vpop.eup %1358  ;;  %v626_v61 = vmul.f32 %v594_v52, %v1714_v40  ;;  %v576_v62 = vmul.f32 %v544_v56, %v1724_v9  ;;  %v1762_v63 = vadd.f32 %v1660_v17, %v1591_v18  ;;  %v1772_v16 = vadd.f32 %v1591_v18, %v1666_v26 }
 0x10c   : > { %v1361_v47 = vpop.eup %1360  ;;  %v766_v48 = vmul.f32 %v734_v0, %v510_v54  ;;  %v750_v49 = vadd.f32 1.0, %v1359_v31  ;;  %v1749_v54 = vadd.f32 %v1591_v18, %v1645_v5  ;;  %1370 = vtanh.f32 %v674_v55 }
 0x10d   : > { %v732_v23 = vadd.f32 1.0, %v1361_v47  ;;  %v1363_v57 = vpop.eup %1362  ;;  %v658_v4 = vadd.f32 %v626_v61, %v1714_v40  ;;  %v608_v8 = vmul.f32 %v576_v62, %v1724_v9  ;;  %1372 = vtanh.f32 %v687_v59 }
 0x10e   : > { %v1149_v53 = vpack.c.bf16 %v766_v48, %v765_v13  ;;  %v782_v28 = vmul.f32 %v750_v49, %v526_v24  ;;  %v748_v24 = vadd.f32 1.0, %v1363_v57  ;;  %v1766_v13 = vadd.f32 %v1664_v25, %v1591_v18 }
 0x10f   : > { %v764_v58 = vmul.f32 %v732_v23, %v508_v6  ;;  %v560_v6 = vmul.f32 0.044715, %v1749_v54  ;;  %v690_v46 = vmul.f32 0.7978846, %v658_v4  ;;  %v549_v17 = vmul.f32 0.044715, %v1762_v63 }
 0x110   : > { %1221 = vst [vmem:[%s1751_s8 + $0x8] sm:$0xff] %v1149_v53   ;;  %v1189_v45 = vpack.c.bf16 %v782_v28, %v781_v51  ;;  %v780_v5 = vmul.f32 %v748_v24, %v524_v7  ;;  %v1365_v7 = vpop.eup %1364  ;;  %v640_v51 = vadd.f32 %v608_v8, %v1724_v9  ;;  %v513_v0 = vmul.f32 0.5, %v1651_v11 }
 0x111   : > { %v1144_v29 = vpack.c.bf16 %v764_v58, %v763_v50  ;;  %v592_v15 = vmul.f32 %v560_v6, %v1749_v54  ;;  %v529_v25 = vmul.f32 0.5, %v1656_v14  ;;  %1374 = vtanh.f32 %v690_v46  ;;  %v1367_v31 = vpop.eup %1366 }
 0x112   : > { %1229 = vst [vmem:[%s1751_s8 + $0x48] sm:$0xff] %v1189_v45   ;;  %v1184_v21 = vpack.c.bf16 %v780_v5, %v779_v1  ;;  %v511_v19 = vmul.f32 0.5, %v1671_v32  ;;  %v672_v26 = vmul.f32 0.7978846, %v640_v51  ;;  %v581_v20 = vmul.f32 %v549_v17, %v1762_v63 }
 0x113   : > { %1145 = vst [vmem:[%s1751_s8] sm:$0xff] %v1144_v29   ;;  %v624_v27 = vmul.f32 %v592_v15, %v1749_v54  ;;  %v565_v41 = vmul.f32 0.044715, %v1766_v13  ;;  %v1784_v47 = vmul.f32 0.5, %v1679_v35  ;;  %v514_v11 = vmul.f32 0.5, %v1682_v36 }
 0x114   : > { %1228 = vst [vmem:[%s1751_s8 + $0x40] sm:$0xff] %v1184_v21   ;;  %v1369_v42 = vpop.eup %1368  ;;  %v547_v48 = vmul.f32 0.044715, %v1772_v16  ;;  %v737_v49 = vadd.f32 1.0, %v1365_v7  ;;  %1376 = vtanh.f32 %v672_v26  ;;  %v613_v39 = vmul.f32 %v581_v20, %v1762_v63 }
 0x115   : > { %v656_v14 = vadd.f32 %v624_v27, %v1749_v54  ;;  %v597_v32 = vmul.f32 %v565_v41, %v1766_v13  ;;  %v1794_v52 = vadd.f32 %v1591_v18, %v1673_v33  ;;  %v1798_v35 = vadd.f32 %v1675_v34, %v1591_v18 }
 0x116   : > { %v579_v23 = vmul.f32 %v547_v48, %v1772_v16  ;;  %v1371_v36 = vpop.eup %1370  ;;  %v753_v53 = vadd.f32 1.0, %v1367_v31  ;;  %v530_v28 = vmul.f32 0.5, %v1714_v40  ;;  %v645_v55 = vadd.f32 %v613_v39, %v1762_v63 }
 0x117   : > { %v688_v50 = vmul.f32 0.7978846, %v656_v14  ;;  %v629_v56 = vmul.f32 %v597_v32, %v1766_v13  ;;  %v738_v57 = vadd.f32 1.0, %v1371_v36  ;;  %v512_v58 = vmul.f32 0.5, %v1724_v9  ;;  %v1373_v29 = vpop.eup %1372 }
 0x118   : > { %v611_v59 = vmul.f32 %v579_v23, %v1772_v16  ;;  %v769_v33 = vmul.f32 %v737_v49, %v513_v0  ;;  %v735_v61 = vadd.f32 1.0, %v1369_v42  ;;  %v563_v34 = vmul.f32 0.044715, %v1794_v52 }
 0x119   : > { %1378 = vtanh.f32 %v688_v50  ;;  %v661_v45 = vadd.f32 %v629_v56, %v1766_v13  ;;  %v770_v24 = vmul.f32 %v738_v57, %v514_v11  ;;  %v677_v62 = vmul.f32 0.7978846, %v645_v55 }
 0x11a   : > { %v643_v40 = vadd.f32 %v611_v59, %v1772_v16  ;;  %v550_v1 = vmul.f32 0.044715, %v1798_v35  ;;  %v785_v4 = vmul.f32 %v753_v53, %v529_v25  ;;  %v528_v9 = vmul.f32 0.5, %v1749_v54 }
 0x11b   : > { %v595_v6 = vmul.f32 %v563_v34, %v1794_v52  ;;  %v1813_v5 = vadd.f32 %v1684_v37, %v1591_v18  ;;  %v1375_v8 = vpop.eup %1374  ;;  %v1159_v46 = vpack.c.bf16 %v770_v24, %v769_v33  ;;  %v693_v15 = vmul.f32 0.7978846, %v661_v45 }
 0x11c   : > { %v582_v7 = vmul.f32 %v550_v1, %v1798_v35  ;;  %v1818_v21 = vadd.f32 %v1591_v18, %v1686_v38  ;;  %v767_v51 = vmul.f32 %v735_v61, %v511_v19  ;;  %v754_v17 = vadd.f32 1.0, %v1375_v8 }
 0x11d   : > { %v675_v0 = vmul.f32 0.7978846, %v643_v40  ;;  %v627_v54 = vmul.f32 %v595_v6, %v1794_v52  ;;  %v751_v25 = vadd.f32 1.0, %v1373_v29  ;;  %1223 = vst [vmem:[%s1751_s8 + $0x18] sm:$0xff] %v1159_v46   ;;  %1380 = vtanh.f32 %v677_v62 }
 0x11e   : > { %v614_v37 = vmul.f32 %v582_v7, %v1798_v35  ;;  %v566_v27 = vmul.f32 0.044715, %v1813_v5  ;;  %v1377_v31 = vpop.eup %1376  ;;  %v786_v26 = vmul.f32 %v754_v17, %v530_v28  ;;  %v548_v41 = vmul.f32 0.044715, %v1818_v21 }
 0x11f   : > { %v659_v20 = vadd.f32 %v627_v54, %v1794_v52  ;;  %v1828_v38 = vadd.f32 %v1591_v18, %v1691_v44  ;;  %v736_v19 = vadd.f32 1.0, %v1377_v31  ;;  %1382 = vtanh.f32 %v693_v15 }
 0x120   : > { %v646_v42 = vadd.f32 %v614_v37, %v1798_v35  ;;  %v598_v11 = vmul.f32 %v566_v27, %v1813_v5  ;;  %v1199_v14 = vpack.c.bf16 %v786_v26, %v785_v4  ;;  %1384 = vtanh.f32 %v675_v0 }
 0x121   : > { %v580_v48 = vmul.f32 %v548_v41, %v1818_v21  ;;  %v1835_v49 = vadd.f32 %v1707_v60, %v1591_v18  ;;  %v768_v32 = vmul.f32 %v736_v19, %v512_v58  ;;  %v564_v23 = vmul.f32 0.044715, %v1828_v38 }
 0x122   : > { %v678_v50 = vmul.f32 0.7978846, %v646_v42  ;;  %v630_v44 = vmul.f32 %v598_v11, %v1813_v5  ;;  %v783_v36 = vmul.f32 %v751_v25, %v1784_v47  ;;  %1231 = vst [vmem:[%s1751_s8 + $0x58] sm:$0xff] %v1199_v14   ;;  %v691_v28 = vmul.f32 0.7978846, %v659_v20 }
 0x123   : > { %v1379_v39 = vpop.eup %1378  ;;  %v612_v55 = vmul.f32 %v580_v48, %v1818_v21  ;;  %v1154_v56 = vpack.c.bf16 %v768_v32, %v767_v51  ;;  %v596_v57 = vmul.f32 %v564_v23, %v1828_v38  ;;  %v553_v33 = vmul.f32 0.044715, %v1835_v49 }
 0x124   : > { %v752_v53 = vadd.f32 1.0, %v1379_v39  ;;  %1386 = vtanh.f32 %v678_v50  ;;  %v662_v60 = vadd.f32 %v630_v44, %v1813_v5  ;;  %v1848_v47 = vadd.f32 %v1716_v2, %v1591_v18 }
 0x125   : > { %v644_v59 = vadd.f32 %v612_v55, %v1818_v21  ;;  %1222 = vst [vmem:[%s1751_s8 + $0x10] sm:$0xff] %v1154_v56   ;;  %v628_v45 = vmul.f32 %v596_v57, %v1828_v38  ;;  %v1854_v34 = vadd.f32 %v1591_v18, %v1718_v3  ;;  %1388 = vtanh.f32 %v691_v28 }
 0x126   : > { %v784_v58 = vmul.f32 %v752_v53, %v528_v9  ;;  %v694_v61 = vmul.f32 0.7978846, %v662_v60  ;;  %v585_v40 = vmul.f32 %v553_v33, %v1835_v49  ;;  %v517_v29 = vmul.f32 0.5, %v1762_v63 }
 0x127   : > { %v676_v62 = vmul.f32 0.7978846, %v644_v59  ;;  %v1381_v1 = vpop.eup %1380  ;;  %v660_v2 = vadd.f32 %v628_v45, %v1828_v38  ;;  %v533_v4 = vmul.f32 0.5, %v1766_v13  ;;  %v569_v3 = vmul.f32 0.044715, %v1848_v47 }
 0x128   : > { %v1194_v24 = vpack.c.bf16 %v784_v58, %v783_v36  ;;  %1390 = vtanh.f32 %v694_v61  ;;  %v617_v9 = vmul.f32 %v585_v40, %v1835_v49  ;;  %v515_v8 = vmul.f32 0.5, %v1772_v16 }
 0x129   : > { %1392 = vtanh.f32 %v676_v62  ;;  %v1383_v6 = vpop.eup %1382  ;;  %v1865_v46 = vmul.f32 0.5, %v1794_v52  ;;  %v692_v15 = vmul.f32 0.7978846, %v660_v2  ;;  %v551_v63 = vmul.f32 0.044715, %v1854_v34 }
 0x12a   : > { %1230 = vst [vmem:[%s1751_s8 + $0x50] sm:$0xff] %v1194_v24   ;;  %v1385_v7 = vpop.eup %1384  ;;  %v518_v51 = vmul.f32 0.5, %v1798_v35  ;;  %v649_v17 = vadd.f32 %v617_v9, %v1835_v49  ;;  %v601_v13 = vmul.f32 %v569_v3, %v1848_v47  ;;  %v1873_v0 = vadd.f32 %v1591_v18, %v1726_v10 }
 0x12b   : > { %v741_v54 = vadd.f32 1.0, %v1381_v1  ;;  %1394 = vtanh.f32 %v692_v15  ;;  %v583_v16 = vmul.f32 %v551_v63, %v1854_v34  ;;  %v1878_v52 = vadd.f32 %v1728_v12, %v1591_v18 }
 0x12c   : > { %v757_v25 = vadd.f32 1.0, %v1383_v6  ;;  %v633_v37 = vmul.f32 %v601_v13, %v1848_v47  ;;  %v567_v35 = vmul.f32 0.044715, %v1873_v0  ;;  %v1884_v27 = vadd.f32 %v1732_v22, %v1591_v18 }
 0x12d   : > { %v739_v10 = vadd.f32 1.0, %v1385_v7  ;;  %v534_v26 = vmul.f32 0.5, %v1813_v5  ;;  %v615_v20 = vmul.f32 %v583_v16, %v1854_v34  ;;  %v554_v41 = vmul.f32 0.044715, %v1878_v52 }
 0x12e   : > { %v1387_v31 = vpop.eup %1386  ;;  %v681_v12 = vmul.f32 0.7978846, %v649_v17  ;;  %v665_v42 = vadd.f32 %v633_v37, %v1848_v47  ;;  %v599_v11 = vmul.f32 %v567_v35, %v1873_v0  ;;  %v773_v14 = vmul.f32 %v741_v54, %v517_v29 }
 0x12f   : > { %v742_v19 = vadd.f32 1.0, %v1387_v31  ;;  %v516_v48 = vmul.f32 0.5, %v1818_v21  ;;  %v532_v22 = vmul.f32 0.5, %v1828_v38  ;;  %v586_v39 = vmul.f32 %v554_v41, %v1878_v52  ;;  %v1389_v32 = vpop.eup %1388 }
 0x130   : > { %v789_v50 = vmul.f32 %v757_v25, %v533_v4  ;;  %v647_v44 = vadd.f32 %v615_v20, %v1854_v34  ;;  %v570_v23 = vmul.f32 0.044715, %v1884_v27  ;;  %v771_v53 = vmul.f32 %v739_v10, %v515_v8 }
 0x131   : > { %v774_v5 = vmul.f32 %v742_v19, %v518_v51  ;;  %v631_v28 = vmul.f32 %v599_v11, %v1873_v0  ;;  %v618_v55 = vmul.f32 %v586_v39, %v1878_v52  ;;  %v1900_v21 = vadd.f32 %v1591_v18, %v1734_v43 }
 0x132   : > { %v1391_v36 = vpop.eup %1390  ;;  %1396 = vtanh.f32 %v681_v12  ;;  %v697_v57 = vmul.f32 0.7978846, %v665_v42  ;;  %v602_v33 = vmul.f32 %v570_v23, %v1884_v27  ;;  %v1906_v61 = vadd.f32 %v1591_v18, %v1739_v30 }
 0x133   : > { %v1393_v38 = vpop.eup %1392  ;;  %v1169_v56 = vpack.c.bf16 %v774_v5, %v773_v14  ;;  %v758_v60 = vadd.f32 1.0, %v1391_v36  ;;  %v650_v59 = vadd.f32 %v618_v55, %v1878_v52  ;;  %v755_v45 = vadd.f32 1.0, %v1389_v32 }
 0x134   : > { %v740_v58 = vadd.f32 1.0, %v1393_v38  ;;  %v679_v62 = vmul.f32 0.7978846, %v647_v44  ;;  %v552_v43 = vmul.f32 0.044715, %v1900_v21  ;;  %v663_v29 = vadd.f32 %v631_v28, %v1873_v0 }
 0x135   : > { %1225 = vst [vmem:[%s1751_s8 + $0x28] sm:$0xff] %v1169_v56   ;;  %v790_v24 = vmul.f32 %v758_v60, %v534_v26  ;;  %v1395_v40 = vpop.eup %1394  ;;  %v682_v2 = vmul.f32 0.7978846, %v650_v59  ;;  %v634_v4 = vmul.f32 %v602_v33, %v1884_v27  ;;  %1398 = vtanh.f32 %v697_v57 }
 0x136   : > { %v772_v1 = vmul.f32 %v740_v58, %v516_v48  ;;  %v756_v3 = vadd.f32 1.0, %v1395_v40  ;;  %v584_v18 = vmul.f32 %v552_v43, %v1900_v21  ;;  %v568_v8 = vmul.f32 0.044715, %v1906_v61 }
 0x137   : > { %v1209_v9 = vpack.c.bf16 %v790_v24, %v789_v50  ;;  %1400 = vtanh.f32 %v682_v2  ;;  %v666_v6 = vadd.f32 %v634_v4, %v1884_v27  ;;  %v787_v15 = vmul.f32 %v755_v45, %v1865_v46 }
 0x138   : > { %v1164_v30 = vpack.c.bf16 %v772_v1, %v771_v53  ;;  %v788_v63 = vmul.f32 %v756_v3, %v532_v22  ;;  %v616_v7 = vmul.f32 %v584_v18, %v1900_v21  ;;  %v695_v51 = vmul.f32 0.7978846, %v663_v29 }
 0x139   : > { %1233 = vst [vmem:[%s1751_s8 + $0x68] sm:$0xff] %v1209_v9   ;;  %v698_v17 = vmul.f32 0.7978846, %v666_v6  ;;  %v600_v13 = vmul.f32 %v568_v8, %v1906_v61  ;;  %1402 = vtanh.f32 %v679_v62  ;;  %v521_v41 = vmul.f32 0.5, %v1835_v49 }
 0x13a   : > { %1224 = vst [vmem:[%s1751_s8 + $0x20] sm:$0xff] %v1164_v30   ;;  %v1204_v54 = vpack.c.bf16 %v788_v63, %v787_v15  ;;  %v648_v16 = vadd.f32 %v616_v7, %v1900_v21  ;;  %v522_v19 = vmul.f32 0.5, %v1878_v52  ;;  %v537_v39 = vmul.f32 0.5, %v1848_v47 }
 0x13b   : > { %1404 = vtanh.f32 %v698_v17  ;;  %v632_v25 = vmul.f32 %v600_v13, %v1906_v61  ;;  %v538_v50 = vmul.f32 0.5, %v1884_v27  ;;  %v519_v53 = vmul.f32 0.5, %v1854_v34 }
 0x13c   : > { %v1397_v37 = vpop.eup %1396  ;;  %1232 = vst [vmem:[%s1751_s8 + $0x60] sm:$0xff] %v1204_v54   ;;  %v680_v35 = vmul.f32 0.7978846, %v648_v16  ;;  %1406 = vtanh.f32 %v695_v51  ;;  %v520_v28 = vmul.f32 0.5, %v1900_v21  ;;  %v535_v57 = vmul.f32 0.5, %v1873_v0 }
 0x13d   : > { %v664_v46 = vadd.f32 %v632_v25, %v1906_v61  ;;  %v745_v26 = vadd.f32 1.0, %v1397_v37  ;;  %v536_v58 = vmul.f32 0.5, %v1906_v61 }
 0x13e   : > { %1408 = vtanh.f32 %v680_v35 }
 0x13f   : > { %v696_v31 = vmul.f32 0.7978846, %v664_v46  ;;  %v1399_v10 = vpop.eup %1398  ;;  %v777_v11 = vmul.f32 %v745_v26, %v521_v41 }
 0x140   : > { %v761_v14 = vadd.f32 1.0, %v1399_v10 }
 0x141   : > { %v1401_v20 = vpop.eup %1400  ;;  %1410 = vtanh.f32 %v696_v31 }
 0x142   : > { %v746_v12 = vadd.f32 1.0, %v1401_v20  ;;  %v793_v49 = vmul.f32 %v761_v14, %v537_v39 }
 0x143   : > { %v1403_v42 = vpop.eup %1402 }
 0x144   : > { %v778_v48 = vmul.f32 %v746_v12, %v522_v19  ;;  %v743_v23 = vadd.f32 1.0, %v1403_v42 }
 0x145   : > { %v1405_v22 = vpop.eup %1404 }
 0x146   : > { %v1179_v32 = vpack.c.bf16 %v778_v48, %v777_v11  ;;  %v762_v5 = vadd.f32 1.0, %v1405_v22  ;;  %v1407_v44 = vpop.eup %1406  ;;  %v775_v27 = vmul.f32 %v743_v23, %v519_v53 }
 0x147   : > { %v759_v47 = vadd.f32 1.0, %v1407_v44 }
 0x148   : > { %v1409_v36 = vpop.eup %1408  ;;  %1227 = vst [vmem:[%s1751_s8 + $0x38] sm:$0xff] %v1179_v32   ;;  %v794_v52 = vmul.f32 %v762_v5, %v538_v50 }
 0x149   : > { %v744_v55 = vadd.f32 1.0, %v1409_v36  ;;  %v791_v21 = vmul.f32 %v759_v47, %v535_v57 }
 0x14a   : > { %v1219_v38 = vpack.c.bf16 %v794_v52, %v793_v49 }
 0x14b   : > { %v1411_v56 = vpop.eup %1410  ;;  %v776_v60 = vmul.f32 %v744_v55, %v520_v28 }
 0x14c   : > { %1235 = vst [vmem:[%s1751_s8 + $0x78] sm:$0xff] %v1219_v38   ;;  %v760_v59 = vadd.f32 1.0, %v1411_v56 }
 0x14d   : > { %v1174_v34 = vpack.c.bf16 %v776_v60, %v775_v27 }
 0x14e   : > { %v792_v33 = vmul.f32 %v760_v59, %v536_v58 }
 0x14f   : > { %1226 = vst [vmem:[%s1751_s8 + $0x30] sm:$0xff] %v1174_v34  }
 0x150   : > { %v1214_v0 = vpack.c.bf16 %v792_v33, %v791_v21 }
 0x152   : > { %1234 = vst [vmem:[%s1751_s8 + $0x70] sm:$0xff] %v1214_v0  }
 0x153   : > { %1425 = shalt.err (!%p1422_p3)
}
 0x154   : > { %s1426_s27 = scalar_lea.hbm %s1940_s19, 2048  ;;  %s1430_s30 = scalar_lea.hbm %s1991_s3, 4096 }
 0x155   : > { %p1427_p4 = scmp.ne.s32.totalorder %s1940_s19, %s1426_s27  ;;  %p1431_p9 = scmp.lt.u32.totalorder %s1940_s19, %s1991_s3 }
 0x156   : > { %p1432_p10 = scmp.lt.u32.totalorder %s1430_s30, %s1426_s27  ;;  %p1434_p12 = scmp.lt.u32.totalorder %s1426_s27, %s1940_s19 }
 0x157   : > { %p1428_p7 = pnand %p1427_p4, %p1537_p5 }
 0x158   : > { %p1433_p11 = por %p1432_p10, %p1431_p9 }
 0x159   : > { %p1429_p8 = pneg %p1428_p7 }
 0x15a   : > { %p1435_p13 = por %p1434_p12, %p1433_p11 }
 0x15c   : > { %p1436_p0 = pnand %p1435_p13, %p1429_p8 }
 0x15e   : > { %1439 = shalt.err (!%p1436_p0)
}
 0x15f   : > { %s1477_s6 = smov 64   ;;  %s1478_s7 = smov 4  }
 0x160   : > { %1291 = dma.vmem_to_hbm [thread:$0]  (%p1537_p5), %s1942_s10, 2048, %s1940_s19, %s1947_s20, %s1477_s6, %s1477_s6, %s1478_s7  }
 0x161 PF: > { %p1297_p1 = scmp.ge.s32.totalorder %s1474_s15, 2  ;;  %s984_s8 = sand.u32 1, %s1462_s12  }
 0x162   : > { %s985_s9 = scalar_lea.sflag [#allocation3], %s984_s8 }
 0x163   : > { %p1294_p2 = pnand %p1297_p1, %p1541_p6 }
 0x165   : > { %1457 = dma.done.wait (!%p1294_p2), %s985_s9, 2048  }
 0x166   : > { %1459 = vsyncadd (!%p1294_p2), %s985_s9, 4294965248  ;;  %p13_p3 = scmp.ge.s32.totalorder %s1524_s18, 4   ;;  %s1994_s12 = smov %s1466_s13 }
 0x167   : > { %s1995_s13 = smov %s1470_s14  ;;  %s1996_s14 = smov %s1535_s21 }
 0x168   : > { %s1997_s15 = smov %s1524_s18  ;;  %15 = sbr.rel (!%p13_p3) target bundleno = 3 (0x3), region = 67 }
 0x16f   :  { %990 = vsyncpa [#allocation3], 1 }
 0x170   :  { %992 = vsyncpa [#allocation3 + $0x1], 1 }

</bundles_post_ra>
